<compile_context>
chip_gen: v7x
topology: tpu7x:2x2x1
jax: 0.10.0
libtpu: 0.0.40
codegen_flags: <defaults>
</compile_context>

<pallas_src>
import functools

import jax
import jax.numpy as jnp
from jax import lax
from jax.experimental import pallas as pl
from jax.experimental.pallas import tpu as pltpu


def _resblock_kernel(x_ref, w1_ref, b1_ref, g1_ref, be1_ref,
                     w2_ref, b2_ref, g2_ref, be2_ref,
                     m_ref, mt_ref, p_ref, pt_ref, o_ref, *, L, G, bb):
    C = x_ref.shape[1]
    N = bb * L
    Bb = bb
    inv_cnt = 1.0 / float((C // G) * L)
    cdt = w1_ref.dtype                  # matmul operand dtype (bf16 fast path or f32)

    # ---- in-VMEM repack: (bb, C, L) -> (C, bb*L); static slice copies, no HBM traffic ----
    x = jnp.concatenate([x_ref[b].astype(jnp.float32) for b in range(bb)], axis=1)

    # ---- hoisted lane-only halo masks (1, N): position within each batch segment ----
    pos = lax.broadcasted_iota(jnp.int32, (1, N), 1) % L
    mask_l = pos >= 1                    # lanes where x[l-1] exists (no cross-batch leak)
    mask_r = pos <= (L - 2)              # lanes where x[l+1] exists

    m = m_ref[...]                       # (G, C)  group one-hot
    mt = mt_ref[...]                     # (C, G)
    P = p_ref[...]                       # (N, Bb) lane -> local-batch one-hot
    Pt = pt_ref[...]                     # (Bb, N)

    def conv3(xin, w_ref, b_ref):
        # same-padded k=3 conv == one (C, 3C) @ (3C, N) matmul on stacked taps
        x_m1 = jnp.where(mask_l, pltpu.roll(xin, shift=1, axis=1), 0.0)       # x[:, l-1]
        x_p1 = jnp.where(mask_r, pltpu.roll(xin, shift=N - 1, axis=1), 0.0)   # x[:, l+1]
        taps = jnp.concatenate(
            [x_m1.astype(cdt), xin.astype(cdt), x_p1.astype(cdt)], axis=0)    # (3C, N)
        y = jnp.dot(w_ref[...], taps, preferred_element_type=jnp.float32)     # (C, N)
        return y + b_ref[...]

    def groupnorm(xin, g_ref, be_ref):
        # per-(batch, group) statistics; P keeps packed batches independent.
        # single packed stat matmul: [x; x^2] @ P  -> (2C, Bb)
        st = jnp.dot(jnp.concatenate([xin, xin * xin], axis=0), P,
                     preferred_element_type=jnp.float32)                      # (2C, Bb)
        gstat = jnp.dot(m, jnp.concatenate([st[:C], st[C:]], axis=1),
                        preferred_element_type=jnp.float32)                   # (G, 2Bb)
        mean_g = gstat[:, :Bb] * inv_cnt
        # NOTE: single-pass E[x^2]-mean^2; clamped at 0 so rsqrt never sees < 0.
        var_g = jnp.maximum(gstat[:, Bb:] * inv_cnt - mean_g * mean_g, 0.0)
        inv_g = lax.rsqrt(var_g + 1e-5)
        cb = jnp.dot(mt, jnp.concatenate([mean_g, inv_g], axis=1),
                     preferred_element_type=jnp.float32)                      # (C, 2Bb)
        scale_cb = cb[:, Bb:] * g_ref[...]                # inv * gamma          (C, Bb)
        shift_cb = be_ref[...] - cb[:, :Bb] * scale_cb    # beta - mean * scale  (C, Bb)
        sc_sh = jnp.dot(jnp.concatenate([scale_cb, shift_cb], axis=0), Pt,
                        preferred_element_type=jnp.float32)                   # (2C, N)
        return xin * sc_sh[:C] + sc_sh[C:]                # folded affine

    def gelu(v):  # exact (erf) gelu -- matches PyTorch F.gelu default
        return 0.5 * v * (1.0 + lax.erf(v * 0.7071067811865475))

    h = gelu(groupnorm(conv3(x, w1_ref, b1_ref), g1_ref, be1_ref))
    h = groupnorm(conv3(h, w2_ref, b2_ref), g2_ref, be2_ref)
    y = gelu(h + x)

    # ---- unpack (C, bb*L) -> per-batch (C, L) stores into the native-layout block ----
    for b in range(bb):
        o_ref[b] = y[:, b * L:(b + 1) * L].astype(o_ref.dtype)


def _pick_bb(B, L, lane_target):
    """Batch elements folded into the lane axis.

    Must divide B (avoids batch padding => no extra HBM copy), prefers bb*L % 128 == 0
    (unmasked wide vregs), and keeps >= 2 grid steps so v7x's two TensorCores both work.
    """
    bb_max = max(1, min(B, -(-lane_target // L)))
    divs = [d for d in range(1, bb_max + 1) if B % d == 0]
    key = lambda d: (((d * L) % 128) == 0, d)
    bb = max(divs, key=key)
    if B > 1 and B // bb < 2:
        small = [d for d in divs if d <= B // 2]
        if small:
            bb = max(small, key=key)
    return bb


def residual_block_1d(x, w1, b1, g1, be1, w2, b2, g2, be2, num_groups,
                      *, compute_dtype=jnp.bfloat16, lane_target=512,
                      vmem_limit_bytes=None):
    """x: (B, C, L).  w*: (C, C, 3) in PyTorch Conv1d (O, I, K) layout.

    Output dtype matches x.dtype (pass bf16 activations to halve HBM traffic).
    lane_target=512 is v7x-safe; raise to 1024-2048 on v5e/v6e for bigger tiles.
    """
    B, C, L = x.shape
    G = num_groups
    assert C % G == 0, "GroupNorm requires channels % num_groups == 0"

    bb = _pick_bb(B, L, lane_target)
    nb = B // bb
    N = bb * L

    # ----- parameter packaging (tiny HBM ops) -----
    # conv weights: (O, I, K) -> (C, 3C) with taps stacked along K; bf16 MXU operands.
    w1k = jnp.transpose(w1, (0, 2, 1)).reshape(C, 3 * C).astype(compute_dtype)
    w2k = jnp.transpose(w2, (0, 2, 1)).reshape(C, 3 * C).astype(compute_dtype)
    b1c, g1c, be1c = b1.reshape(C, 1), g1.reshape(C, 1), be1.reshape(C, 1)
    b2c, g2c, be2c = b2.reshape(C, 1), g2.reshape(C, 1), be2.reshape(C, 1)
    # group one-hots ({0,1} selections kept in f32 so stat matmuls stay exact)
    gid = jnp.arange(C) // (C // G)
    m = (gid[None, :] == jnp.arange(G)[:, None]).astype(jnp.float32)    # (G, C)
    mt = m.T                                                            # (C, G)
    # lane -> local-batch one-hot (per-batch GroupNorm stats with packed lanes)
    lb = jnp.arange(N) // L
    P = (lb[:, None] == jnp.arange(bb)[None, :]).astype(jnp.float32)    # (N, bb)
    Pt = P.T                                                            # (bb, N)

    # ----- VMEM limit: auto-size, capped at 64 MiB so it is valid on v7x -----
    if vmem_limit_bytes is None:
        est = 4 * (20 * C * N + 2 * C * 3 * C + 2 * G * C + 2 * N * bb + 8 * C)
        vmem_limit_bytes = int(max(32 << 20, min(64 << 20, 2 * est)))

    full = lambda shape: pl.BlockSpec(shape, lambda i: (0,) * len(shape))
    out = pl.pallas_call(
        functools.partial(_resblock_kernel, L=L, G=G, bb=bb),
        out_shape=jax.ShapeDtypeStruct((B, C, L), x.dtype),
        grid_spec=pltpu.PrefetchScalarGridSpec(
            num_scalar_prefetch=0,
            grid=(nb,),
            in_specs=[
                pl.BlockSpec((bb, C, L), lambda i: (i, 0, 0)),                 # x block
                full((C, 3 * C)), full((C, 1)), full((C, 1)), full((C, 1)),    # conv1/gn1
                full((C, 3 * C)), full((C, 1)), full((C, 1)), full((C, 1)),    # conv2/gn2
                full((G, C)), full((C, G)),                                    # group one-hots
                full((N, bb)), full((bb, N)),                                  # lane->batch
            ],
            out_specs=pl.BlockSpec((bb, C, L), lambda i: (i, 0, 0)),
        ),
        compiler_params=pltpu.CompilerParams(
            dimension_semantics=("parallel",),
            vmem_limit_bytes=vmem_limit_bytes,
        ),
    )(x, w1k, b1c, g1c, be1c, w2k, b2c, g2c, be2c, m, mt, P, Pt)
    return out


# ---------------- pure-JAX reference (for correctness check) ----------------
def _ref_forward(x, w1, b1, g1, be1, w2, b2, g2, be2, num_groups):
    def conv1d(xin, w, b):
        y = lax.conv_general_dilated(xin, w, (1,), ((1, 1),),
                                     dimension_numbers=("NCH", "OIH", "NCH"),
                                     precision=lax.Precision.HIGHEST)
        return y + b[None, :, None]

    def gn(xin, gamma, beta, G):
        B, C, L = xin.shape
        xg = xin.reshape(B, G, (C // G) * L)
        mean = xg.mean(-1, keepdims=True)
        var = ((xg - mean) ** 2).mean(-1, keepdims=True)
        xn = ((xg - mean) / jnp.sqrt(var + 1e-5)).reshape(B, C, L)
        return xn * gamma[None, :, None] + beta[None, :, None]

    gelu = lambda v: 0.5 * v * (1.0 + lax.erf(v / jnp.sqrt(2.0)))
    h = gelu(gn(conv1d(x, w1, b1), g1, be1, num_groups))
    h = gn(conv1d(h, w2, b2), g2, be2, num_groups)
    return gelu(h + x)


if __name__ == "__main__":
    B, C, L = 2, 16, 16
    num_groups = min(32, C // 4)  # GroupNorm(min(32, channels // 4), channels)

    key = jax.random.PRNGKey(0)
    ks = jax.random.split(key, 9)
    x = jax.random.normal(ks[0], (B, C, L), jnp.float32)
    w1 = jax.random.normal(ks[1], (C, C, 3), jnp.float32) * 0.1
    b1 = jax.random.normal(ks[2], (C,), jnp.float32) * 0.1
    w2 = jax.random.normal(ks[3], (C, C, 3), jnp.float32) * 0.1
    b2 = jax.random.normal(ks[4], (C,), jnp.float32) * 0.1
    g1 = 1.0 + 0.1 * jax.random.normal(ks[5], (C,), jnp.float32)
    be1 = 0.1 * jax.random.normal(ks[6], (C,), jnp.float32)
    g2 = 1.0 + 0.1 * jax.random.normal(ks[7], (C,), jnp.float32)
    be2 = 0.1 * jax.random.normal(ks[8], (C,), jnp.float32)

    ref = _ref_forward(x, w1, b1, g1, be1, w2, b2, g2, be2, num_groups)

    # f32 matmul operands: tight structural check against the pure-JAX reference.
    out_f32 = jax.block_until_ready(
        residual_block_1d(x, w1, b1, g1, be1, w2, b2, g2, be2, num_groups,
                          compute_dtype=jnp.float32))
    assert out_f32.shape == (B, C, L)
    err32 = float(jnp.max(jnp.abs(out_f32 - ref)))
    assert jnp.allclose(out_f32, ref, atol=1e-3, rtol=1e-3), f"f32 err={err32}"

    # bf16 matmul operands (default fast path), f32 accumulation on the MXU.
    out_bf16 = jax.block_until_ready(
        residual_block_1d(x, w1, b1, g1, be1, w2, b2, g2, be2, num_groups))
    errbf = float(jnp.max(jnp.abs(out_bf16 - ref)))
    assert jnp.allclose(out_bf16, ref, atol=5e-2, rtol=5e-2), f"bf16 err={errbf}"

    print("KERNEL_OK")
</pallas_src>

<mosaic_0001>
module attributes {stable_mosaic.version = 11 : i64} {
  func.func @_resblock_kernel(%arg0: i32, %arg1: memref<1x16x16xf32, #tpu.memory_space<vmem>>, %arg2: memref<16x48xf32, #tpu.memory_space<vmem>>, %arg3: memref<16x1xf32, #tpu.memory_space<vmem>>, %arg4: memref<16x1xf32, #tpu.memory_space<vmem>>, %arg5: memref<16x1xf32, #tpu.memory_space<vmem>>, %arg6: memref<16x48xf32, #tpu.memory_space<vmem>>, %arg7: memref<16x1xf32, #tpu.memory_space<vmem>>, %arg8: memref<16x1xf32, #tpu.memory_space<vmem>>, %arg9: memref<16x1xf32, #tpu.memory_space<vmem>>, %arg10: memref<4x16xf32, #tpu.memory_space<vmem>>, %arg11: memref<16x4xf32, #tpu.memory_space<vmem>>, %arg12: memref<16x1xf32, #tpu.memory_space<vmem>>, %arg13: memref<1x16xf32, #tpu.memory_space<vmem>>, %arg14: memref<1x16x16xf32, #tpu.memory_space<vmem>>) attributes {dimension_semantics = [#tpu.dimension_semantics<parallel>], iteration_bounds = array<i64: 2>, scalar_prefetch = 0 : i64, scratch_operands = 0 : i64, tpu.core_type = #tpu.core_type<tc>, window_params = [{transform_indices = @transform_0, window_bounds = array<i64: 1, 16, 16>}, {pipeline_mode = #tpu.pipeline_mode<synchronous>, transform_indices = @transform_1, window_bounds = array<i64: 16, 48>}, {pipeline_mode = #tpu.pipeline_mode<synchronous>, transform_indices = @transform_2, window_bounds = array<i64: 16, 1>}, {pipeline_mode = #tpu.pipeline_mode<synchronous>, transform_indices = @transform_3, window_bounds = array<i64: 16, 1>}, {pipeline_mode = #tpu.pipeline_mode<synchronous>, transform_indices = @transform_4, window_bounds = array<i64: 16, 1>}, {pipeline_mode = #tpu.pipeline_mode<synchronous>, transform_indices = @transform_5, window_bounds = array<i64: 16, 48>}, {pipeline_mode = #tpu.pipeline_mode<synchronous>, transform_indices = @transform_6, window_bounds = array<i64: 16, 1>}, {pipeline_mode = #tpu.pipeline_mode<synchronous>, transform_indices = @transform_7, window_bounds = array<i64: 16, 1>}, {pipeline_mode = #tpu.pipeline_mode<synchronous>, transform_indices = @transform_8, window_bounds = array<i64: 16, 1>}, {pipeline_mode = #tpu.pipeline_mode<synchronous>, transform_indices = @transform_9, window_bounds = array<i64: 4, 16>}, {pipeline_mode = #tpu.pipeline_mode<synchronous>, transform_indices = @transform_10, window_bounds = array<i64: 16, 4>}, {pipeline_mode = #tpu.pipeline_mode<synchronous>, transform_indices = @transform_11, window_bounds = array<i64: 16, 1>}, {pipeline_mode = #tpu.pipeline_mode<synchronous>, transform_indices = @transform_12, window_bounds = array<i64: 1, 16>}, {transform_indices = @transform_13, window_bounds = array<i64: 1, 16, 16>}]} {
    %c0 = arith.constant 0 : index
    %c0_0 = arith.constant 0 : index
    %c0_1 = arith.constant 0 : index
    %0 = vector.load %arg1[%c0, %c0_0, %c0_1] : memref<1x16x16xf32, #tpu.memory_space<vmem>>, vector<1x16x16xf32>
    %1 = vector.shape_cast %0 : vector<1x16x16xf32> to vector<16x16xf32>
    %2 = tpu.iota {dimensions = array<i32: 1>} : vector<1x16xi32>
    %c16_i32 = arith.constant 16 : i32
    %c0_i32 = arith.constant 0 : i32
    %3 = arith.cmpi eq, %c16_i32, %c0_i32 : i32
    %c1_i32 = arith.constant 1 : i32
    %4 = arith.select %3, %c1_i32, %c16_i32 : i32
    %5 = vector.broadcast %4 : i32 to vector<1x16xi32>
    %6 = arith.remsi %2, %5 : vector<1x16xi32>
    %c0_i32_2 = arith.constant 0 : i32
    %7 = vector.broadcast %c0_i32_2 : i32 to vector<1x16xi32>
    %8 = arith.cmpi ne, %6, %7 : vector<1x16xi32>
    %c0_i32_3 = arith.constant 0 : i32
    %9 = vector.broadcast %c0_i32_3 : i32 to vector<1x16xi32>
    %10 = arith.cmpi slt, %6, %9 : vector<1x16xi32>
    %c0_i32_4 = arith.constant 0 : i32
    %11 = arith.cmpi slt, %4, %c0_i32_4 : i32
    %12 = vector.broadcast %11 : i1 to vector<1x16xi1>
    %13 = vector.broadcast %12 : vector<1x16xi1> to vector<1x16xi1>
    %14 = arith.xori %10, %13 : vector<1x16xi1>
    %15 = arith.andi %14, %8 : vector<1x16xi1>
    %16 = vector.broadcast %4 : i32 to vector<1x16xi32>
    %17 = arith.addi %6, %16 : vector<1x16xi32>
    %18 = arith.select %15, %17, %6 : vector<1x16xi1>, vector<1x16xi32>
    %c1_i32_5 = arith.constant 1 : i32
    %19 = vector.broadcast %c1_i32_5 : i32 to vector<1x16xi32>
    %20 = arith.cmpi sge, %18, %19 : vector<1x16xi32>
    %c14_i32 = arith.constant 14 : i32
    %21 = vector.broadcast %c14_i32 : i32 to vector<1x16xi32>
    %22 = arith.cmpi sle, %18, %21 : vector<1x16xi32>
    %c0_6 = arith.constant 0 : index
    %c0_7 = arith.constant 0 : index
    %23 = vector.load %arg10[%c0_6, %c0_7] : memref<4x16xf32, #tpu.memory_space<vmem>>, vector<4x16xf32>
    %c0_8 = arith.constant 0 : index
    %c0_9 = arith.constant 0 : index
    %24 = vector.load %arg11[%c0_8, %c0_9] : memref<16x4xf32, #tpu.memory_space<vmem>>, vector<16x4xf32>
    %c0_10 = arith.constant 0 : index
    %c0_11 = arith.constant 0 : index
    %25 = vector.load %arg12[%c0_10, %c0_11] : memref<16x1xf32, #tpu.memory_space<vmem>>, vector<16x1xf32>
    %c0_12 = arith.constant 0 : index
    %c0_13 = arith.constant 0 : index
    %26 = vector.load %arg13[%c0_12, %c0_13] : memref<1x16xf32, #tpu.memory_space<vmem>>, vector<1x16xf32>
    %c1_i32_14 = arith.constant 1 : i32
    %27 = tpu.dynamic_rotate %1 by %c1_i32_14 dim 1 : vector<16x16xf32>, i32 -> vector<16x16xf32>
    %cst = arith.constant 0.000000e+00 : f32
    %28 = vector.shape_cast %20 : vector<1x16xi1> to vector<1x16xi1>
    %29 = vector.broadcast %28 : vector<1x16xi1> to vector<16x16xi1>
    %30 = vector.broadcast %cst : f32 to vector<16x16xf32>
    %31 = arith.select %29, %27, %30 : vector<16x16xi1>, vector<16x16xf32>
    %c15_i32 = arith.constant 15 : i32
    %32 = tpu.dynamic_rotate %1 by %c15_i32 dim 1 : vector<16x16xf32>, i32 -> vector<16x16xf32>
    %cst_15 = arith.constant 0.000000e+00 : f32
    %33 = vector.shape_cast %22 : vector<1x16xi1> to vector<1x16xi1>
    %34 = vector.broadcast %33 : vector<1x16xi1> to vector<16x16xi1>
    %35 = vector.broadcast %cst_15 : f32 to vector<16x16xf32>
    %36 = arith.select %34, %32, %35 : vector<16x16xi1>, vector<16x16xf32>
    %37 = tpu.concatenate %31, %1, %36 in 0 : vector<16x16xf32>, vector<16x16xf32>, vector<16x16xf32> -> vector<48x16xf32>
    %c0_16 = arith.constant 0 : index
    %c0_17 = arith.constant 0 : index
    %38 = vector.load %arg2[%c0_16, %c0_17] : memref<16x48xf32, #tpu.memory_space<vmem>>, vector<16x48xf32>
    %cst_18 = arith.constant dense<0.000000e+00> : vector<16x16xf32>
    %39 = tpu.matmul %38, %37, %cst_18 {dimension_numbers = #tpu.dot_dimension_numbers<[1], [0], [0], [1], [0, 0, 1, 1], [], []>} : vector<16x48xf32>, vector<48x16xf32>, vector<16x16xf32> -> vector<16x16xf32>
    %c0_19 = arith.constant 0 : index
    %c0_20 = arith.constant 0 : index
    %40 = vector.load %arg3[%c0_19, %c0_20] : memref<16x1xf32, #tpu.memory_space<vmem>>, vector<16x1xf32>
    %41 = vector.broadcast %40 : vector<16x1xf32> to vector<16x16xf32>
    %42 = arith.addf %39, %41 : vector<16x16xf32>
    %43 = arith.mulf %42, %42 : vector<16x16xf32>
    %44 = tpu.concatenate %42, %43 in 0 : vector<16x16xf32>, vector<16x16xf32> -> vector<32x16xf32>
    %cst_21 = arith.constant dense<0.000000e+00> : vector<32x1xf32>
    %45 = tpu.matmul %44, %25, %cst_21 {dimension_numbers = #tpu.dot_dimension_numbers<[1], [0], [0], [1], [0, 0, 1, 1], [], []>} : vector<32x16xf32>, vector<16x1xf32>, vector<32x1xf32> -> vector<32x1xf32>
    %46 = vector.extract_strided_slice %45 {offsets = [0, 0], sizes = [16, 1], strides = [1, 1]} : vector<32x1xf32> to vector<16x1xf32>
    %47 = vector.extract_strided_slice %45 {offsets = [16, 0], sizes = [16, 1], strides = [1, 1]} : vector<32x1xf32> to vector<16x1xf32>
    %48 = tpu.concatenate %46, %47 in 1 : vector<16x1xf32>, vector<16x1xf32> -> vector<16x2xf32>
    %cst_22 = arith.constant dense<0.000000e+00> : vector<4x2xf32>
    %49 = tpu.matmul %23, %48, %cst_22 {dimension_numbers = #tpu.dot_dimension_numbers<[1], [0], [0], [1], [0, 0, 1, 1], [], []>} : vector<4x16xf32>, vector<16x2xf32>, vector<4x2xf32> -> vector<4x2xf32>
    %50 = vector.extract_strided_slice %49 {offsets = [0, 0], sizes = [4, 1], strides = [1, 1]} : vector<4x2xf32> to vector<4x1xf32>
    %cst_23 = arith.constant 1.562500e-02 : f32
    %51 = vector.broadcast %cst_23 : f32 to vector<4x1xf32>
    %52 = arith.mulf %50, %51 : vector<4x1xf32>
    %53 = vector.extract_strided_slice %49 {offsets = [0, 1], sizes = [4, 1], strides = [1, 1]} : vector<4x2xf32> to vector<4x1xf32>
    %cst_24 = arith.constant 1.562500e-02 : f32
    %54 = vector.broadcast %cst_24 : f32 to vector<4x1xf32>
    %55 = arith.mulf %53, %54 : vector<4x1xf32>
    %56 = arith.mulf %52, %52 : vector<4x1xf32>
    %57 = arith.subf %55, %56 : vector<4x1xf32>
    %cst_25 = arith.constant 0.000000e+00 : f32
    %58 = vector.broadcast %cst_25 : f32 to vector<4x1xf32>
    %59 = arith.maximumf %57, %58 : vector<4x1xf32>
    %cst_26 = arith.constant 9.99999974E-6 : f32
    %60 = vector.broadcast %cst_26 : f32 to vector<4x1xf32>
    %61 = arith.addf %59, %60 : vector<4x1xf32>
    %62 = math.rsqrt %61 : vector<4x1xf32>
    %63 = tpu.concatenate %52, %62 in 1 : vector<4x1xf32>, vector<4x1xf32> -> vector<4x2xf32>
    %cst_27 = arith.constant dense<0.000000e+00> : vector<16x2xf32>
    %64 = tpu.matmul %24, %63, %cst_27 {dimension_numbers = #tpu.dot_dimension_numbers<[1], [0], [0], [1], [0, 0, 1, 1], [], []>} : vector<16x4xf32>, vector<4x2xf32>, vector<16x2xf32> -> vector<16x2xf32>
    %65 = vector.extract_strided_slice %64 {offsets = [0, 1], sizes = [16, 1], strides = [1, 1]} : vector<16x2xf32> to vector<16x1xf32>
    %c0_28 = arith.constant 0 : index
    %c0_29 = arith.constant 0 : index
    %66 = vector.load %arg4[%c0_28, %c0_29] : memref<16x1xf32, #tpu.memory_space<vmem>>, vector<16x1xf32>
    %67 = arith.mulf %65, %66 : vector<16x1xf32>
    %c0_30 = arith.constant 0 : index
    %c0_31 = arith.constant 0 : index
    %68 = vector.load %arg5[%c0_30, %c0_31] : memref<16x1xf32, #tpu.memory_space<vmem>>, vector<16x1xf32>
    %69 = vector.extract_strided_slice %64 {offsets = [0, 0], sizes = [16, 1], strides = [1, 1]} : vector<16x2xf32> to vector<16x1xf32>
    %70 = arith.mulf %69, %67 : vector<16x1xf32>
    %71 = arith.subf %68, %70 : vector<16x1xf32>
    %72 = tpu.concatenate %67, %71 in 0 : vector<16x1xf32>, vector<16x1xf32> -> vector<32x1xf32>
    %cst_32 = arith.constant dense<0.000000e+00> : vector<32x16xf32>
    %73 = tpu.matmul %72, %26, %cst_32 {dimension_numbers = #tpu.dot_dimension_numbers<[1], [0], [0], [1], [0, 0, 1, 1], [], []>} : vector<32x1xf32>, vector<1x16xf32>, vector<32x16xf32> -> vector<32x16xf32>
    %74 = vector.extract_strided_slice %73 {offsets = [0, 0], sizes = [16, 16], strides = [1, 1]} : vector<32x16xf32> to vector<16x16xf32>
    %75 = arith.mulf %42, %74 : vector<16x16xf32>
    %76 = vector.extract_strided_slice %73 {offsets = [16, 0], sizes = [16, 16], strides = [1, 1]} : vector<32x16xf32> to vector<16x16xf32>
    %77 = arith.addf %75, %76 : vector<16x16xf32>
    %cst_33 = arith.constant 5.000000e-01 : f32
    %78 = vector.broadcast %cst_33 : f32 to vector<16x16xf32>
    %79 = arith.mulf %78, %77 : vector<16x16xf32>
    %cst_34 = arith.constant 0.707106769 : f32
    %80 = vector.broadcast %cst_34 : f32 to vector<16x16xf32>
    %81 = arith.mulf %77, %80 : vector<16x16xf32>
    %82 = math.erf %81 : vector<16x16xf32>
    %cst_35 = arith.constant 1.000000e+00 : f32
    %83 = vector.broadcast %cst_35 : f32 to vector<16x16xf32>
    %84 = arith.addf %83, %82 : vector<16x16xf32>
    %85 = arith.mulf %79, %84 : vector<16x16xf32>
    %c1_i32_36 = arith.constant 1 : i32
    %86 = tpu.dynamic_rotate %85 by %c1_i32_36 dim 1 : vector<16x16xf32>, i32 -> vector<16x16xf32>
    %cst_37 = arith.constant 0.000000e+00 : f32
    %87 = vector.shape_cast %20 : vector<1x16xi1> to vector<1x16xi1>
    %88 = vector.broadcast %87 : vector<1x16xi1> to vector<16x16xi1>
    %89 = vector.broadcast %cst_37 : f32 to vector<16x16xf32>
    %90 = arith.select %88, %86, %89 : vector<16x16xi1>, vector<16x16xf32>
    %c15_i32_38 = arith.constant 15 : i32
    %91 = tpu.dynamic_rotate %85 by %c15_i32_38 dim 1 : vector<16x16xf32>, i32 -> vector<16x16xf32>
    %cst_39 = arith.constant 0.000000e+00 : f32
    %92 = vector.shape_cast %22 : vector<1x16xi1> to vector<1x16xi1>
    %93 = vector.broadcast %92 : vector<1x16xi1> to vector<16x16xi1>
    %94 = vector.broadcast %cst_39 : f32 to vector<16x16xf32>
    %95 = arith.select %93, %91, %94 : vector<16x16xi1>, vector<16x16xf32>
    %96 = tpu.concatenate %90, %85, %95 in 0 : vector<16x16xf32>, vector<16x16xf32>, vector<16x16xf32> -> vector<48x16xf32>
    %c0_40 = arith.constant 0 : index
    %c0_41 = arith.constant 0 : index
    %97 = vector.load %arg6[%c0_40, %c0_41] : memref<16x48xf32, #tpu.memory_space<vmem>>, vector<16x48xf32>
    %cst_42 = arith.constant dense<0.000000e+00> : vector<16x16xf32>
    %98 = tpu.matmul %97, %96, %cst_42 {dimension_numbers = #tpu.dot_dimension_numbers<[1], [0], [0], [1], [0, 0, 1, 1], [], []>} : vector<16x48xf32>, vector<48x16xf32>, vector<16x16xf32> -> vector<16x16xf32>
    %c0_43 = arith.constant 0 : index
    %c0_44 = arith.constant 0 : index
    %99 = vector.load %arg7[%c0_43, %c0_44] : memref<16x1xf32, #tpu.memory_space<vmem>>, vector<16x1xf32>
    %100 = vector.broadcast %99 : vector<16x1xf32> to vector<16x16xf32>
    %101 = arith.addf %98, %100 : vector<16x16xf32>
    %102 = arith.mulf %101, %101 : vector<16x16xf32>
    %103 = tpu.concatenate %101, %102 in 0 : vector<16x16xf32>, vector<16x16xf32> -> vector<32x16xf32>
    %cst_45 = arith.constant dense<0.000000e+00> : vector<32x1xf32>
    %104 = tpu.matmul %103, %25, %cst_45 {dimension_numbers = #tpu.dot_dimension_numbers<[1], [0], [0], [1], [0, 0, 1, 1], [], []>} : vector<32x16xf32>, vector<16x1xf32>, vector<32x1xf32> -> vector<32x1xf32>
    %105 = vector.extract_strided_slice %104 {offsets = [0, 0], sizes = [16, 1], strides = [1, 1]} : vector<32x1xf32> to vector<16x1xf32>
    %106 = vector.extract_strided_slice %104 {offsets = [16, 0], sizes = [16, 1], strides = [1, 1]} : vector<32x1xf32> to vector<16x1xf32>
    %107 = tpu.concatenate %105, %106 in 1 : vector<16x1xf32>, vector<16x1xf32> -> vector<16x2xf32>
    %cst_46 = arith.constant dense<0.000000e+00> : vector<4x2xf32>
    %108 = tpu.matmul %23, %107, %cst_46 {dimension_numbers = #tpu.dot_dimension_numbers<[1], [0], [0], [1], [0, 0, 1, 1], [], []>} : vector<4x16xf32>, vector<16x2xf32>, vector<4x2xf32> -> vector<4x2xf32>
    %109 = vector.extract_strided_slice %108 {offsets = [0, 0], sizes = [4, 1], strides = [1, 1]} : vector<4x2xf32> to vector<4x1xf32>
    %cst_47 = arith.constant 1.562500e-02 : f32
    %110 = vector.broadcast %cst_47 : f32 to vector<4x1xf32>
    %111 = arith.mulf %109, %110 : vector<4x1xf32>
    %112 = vector.extract_strided_slice %108 {offsets = [0, 1], sizes = [4, 1], strides = [1, 1]} : vector<4x2xf32> to vector<4x1xf32>
    %cst_48 = arith.constant 1.562500e-02 : f32
    %113 = vector.broadcast %cst_48 : f32 to vector<4x1xf32>
    %114 = arith.mulf %112, %113 : vector<4x1xf32>
    %115 = arith.mulf %111, %111 : vector<4x1xf32>
    %116 = arith.subf %114, %115 : vector<4x1xf32>
    %cst_49 = arith.constant 0.000000e+00 : f32
    %117 = vector.broadcast %cst_49 : f32 to vector<4x1xf32>
    %118 = arith.maximumf %116, %117 : vector<4x1xf32>
    %cst_50 = arith.constant 9.99999974E-6 : f32
    %119 = vector.broadcast %cst_50 : f32 to vector<4x1xf32>
    %120 = arith.addf %118, %119 : vector<4x1xf32>
    %121 = math.rsqrt %120 : vector<4x1xf32>
    %122 = tpu.concatenate %111, %121 in 1 : vector<4x1xf32>, vector<4x1xf32> -> vector<4x2xf32>
    %cst_51 = arith.constant dense<0.000000e+00> : vector<16x2xf32>
    %123 = tpu.matmul %24, %122, %cst_51 {dimension_numbers = #tpu.dot_dimension_numbers<[1], [0], [0], [1], [0, 0, 1, 1], [], []>} : vector<16x4xf32>, vector<4x2xf32>, vector<16x2xf32> -> vector<16x2xf32>
    %124 = vector.extract_strided_slice %123 {offsets = [0, 1], sizes = [16, 1], strides = [1, 1]} : vector<16x2xf32> to vector<16x1xf32>
    %c0_52 = arith.constant 0 : index
    %c0_53 = arith.constant 0 : index
    %125 = vector.load %arg8[%c0_52, %c0_53] : memref<16x1xf32, #tpu.memory_space<vmem>>, vector<16x1xf32>
    %126 = arith.mulf %124, %125 : vector<16x1xf32>
    %c0_54 = arith.constant 0 : index
    %c0_55 = arith.constant 0 : index
    %127 = vector.load %arg9[%c0_54, %c0_55] : memref<16x1xf32, #tpu.memory_space<vmem>>, vector<16x1xf32>
    %128 = vector.extract_strided_slice %123 {offsets = [0, 0], sizes = [16, 1], strides = [1, 1]} : vector<16x2xf32> to vector<16x1xf32>
    %129 = arith.mulf %128, %126 : vector<16x1xf32>
    %130 = arith.subf %127, %129 : vector<16x1xf32>
    %131 = tpu.concatenate %126, %130 in 0 : vector<16x1xf32>, vector<16x1xf32> -> vector<32x1xf32>
    %cst_56 = arith.constant dense<0.000000e+00> : vector<32x16xf32>
    %132 = tpu.matmul %131, %26, %cst_56 {dimension_numbers = #tpu.dot_dimension_numbers<[1], [0], [0], [1], [0, 0, 1, 1], [], []>} : vector<32x1xf32>, vector<1x16xf32>, vector<32x16xf32> -> vector<32x16xf32>
    %133 = vector.extract_strided_slice %132 {offsets = [0, 0], sizes = [16, 16], strides = [1, 1]} : vector<32x16xf32> to vector<16x16xf32>
    %134 = arith.mulf %101, %133 : vector<16x16xf32>
    %135 = vector.extract_strided_slice %132 {offsets = [16, 0], sizes = [16, 16], strides = [1, 1]} : vector<32x16xf32> to vector<16x16xf32>
    %136 = arith.addf %134, %135 : vector<16x16xf32>
    %137 = arith.addf %136, %1 : vector<16x16xf32>
    %cst_57 = arith.constant 5.000000e-01 : f32
    %138 = vector.broadcast %cst_57 : f32 to vector<16x16xf32>
    %139 = arith.mulf %138, %137 : vector<16x16xf32>
    %cst_58 = arith.constant 0.707106769 : f32
    %140 = vector.broadcast %cst_58 : f32 to vector<16x16xf32>
    %141 = arith.mulf %137, %140 : vector<16x16xf32>
    %142 = math.erf %141 : vector<16x16xf32>
    %cst_59 = arith.constant 1.000000e+00 : f32
    %143 = vector.broadcast %cst_59 : f32 to vector<16x16xf32>
    %144 = arith.addf %143, %142 : vector<16x16xf32>
    %145 = arith.mulf %139, %144 : vector<16x16xf32>
    %c0_60 = arith.constant 0 : index
    %c0_61 = arith.constant 0 : index
    %c0_62 = arith.constant 0 : index
    %146 = vector.load %arg14[%c0_60, %c0_61, %c0_62] : memref<1x16x16xf32, #tpu.memory_space<vmem>>, vector<1x16x16xf32>
    %147 = vector.shape_cast %146 : vector<1x16x16xf32> to vector<16x16xf32>
    %148 = vector.shape_cast %145 : vector<16x16xf32> to vector<1x16x16xf32>
    tpu.vector_store %arg14[%c0_60, %c0_61, %c0_62], %148 {strides = array<i32>} : memref<1x16x16xf32, #tpu.memory_space<vmem>>, vector<1x16x16xf32>,
    return
  }
  func.func @transform_0(%arg0: i32) -> (i32, i32, i32) {
    %c0_i32 = arith.constant 0 : i32
    %c0_i32_0 = arith.constant 0 : i32
    %c0_i32_1 = arith.constant 0 : i32
    return %arg0, %c0_i32, %c0_i32_0 : i32, i32, i32
  }
  func.func @transform_1(%arg0: i32) -> (i32, i32) {
    %c0_i32 = arith.constant 0 : i32
    %c0_i32_0 = arith.constant 0 : i32
    %c0_i32_1 = arith.constant 0 : i32
    return %c0_i32, %c0_i32_0 : i32, i32
  }
  func.func @transform_2(%arg0: i32) -> (i32, i32) {
    %c0_i32 = arith.constant 0 : i32
    %c0_i32_0 = arith.constant 0 : i32
    %c0_i32_1 = arith.constant 0 : i32
    return %c0_i32, %c0_i32_0 : i32, i32
  }
  func.func @transform_3(%arg0: i32) -> (i32, i32) {
    %c0_i32 = arith.constant 0 : i32
    %c0_i32_0 = arith.constant 0 : i32
    %c0_i32_1 = arith.constant 0 : i32
    return %c0_i32, %c0_i32_0 : i32, i32
  }
  func.func @transform_4(%arg0: i32) -> (i32, i32) {
    %c0_i32 = arith.constant 0 : i32
    %c0_i32_0 = arith.constant 0 : i32
    %c0_i32_1 = arith.constant 0 : i32
    return %c0_i32, %c0_i32_0 : i32, i32
  }
  func.func @transform_5(%arg0: i32) -> (i32, i32) {
    %c0_i32 = arith.constant 0 : i32
    %c0_i32_0 = arith.constant 0 : i32
    %c0_i32_1 = arith.constant 0 : i32
    return %c0_i32, %c0_i32_0 : i32, i32
  }
  func.func @transform_6(%arg0: i32) -> (i32, i32) {
    %c0_i32 = arith.constant 0 : i32
    %c0_i32_0 = arith.constant 0 : i32
    %c0_i32_1 = arith.constant 0 : i32
    return %c0_i32, %c0_i32_0 : i32, i32
  }
  func.func @transform_7(%arg0: i32) -> (i32, i32) {
    %c0_i32 = arith.constant 0 : i32
    %c0_i32_0 = arith.constant 0 : i32
    %c0_i32_1 = arith.constant 0 : i32
    return %c0_i32, %c0_i32_0 : i32, i32
  }
  func.func @transform_8(%arg0: i32) -> (i32, i32) {
    %c0_i32 = arith.constant 0 : i32
    %c0_i32_0 = arith.constant 0 : i32
    %c0_i32_1 = arith.constant 0 : i32
    return %c0_i32, %c0_i32_0 : i32, i32
  }
  func.func @transform_9(%arg0: i32) -> (i32, i32) {
    %c0_i32 = arith.constant 0 : i32
    %c0_i32_0 = arith.constant 0 : i32
    %c0_i32_1 = arith.constant 0 : i32
    return %c0_i32, %c0_i32_0 : i32, i32
  }
  func.func @transform_10(%arg0: i32) -> (i32, i32) {
    %c0_i32 = arith.constant 0 : i32
    %c0_i32_0 = arith.constant 0 : i32
    %c0_i32_1 = arith.constant 0 : i32
    return %c0_i32, %c0_i32_0 : i32, i32
  }
  func.func @transform_11(%arg0: i32) -> (i32, i32) {
    %c0_i32 = arith.constant 0 : i32
    %c0_i32_0 = arith.constant 0 : i32
    %c0_i32_1 = arith.constant 0 : i32
    return %c0_i32, %c0_i32_0 : i32, i32
  }
  func.func @transform_12(%arg0: i32) -> (i32, i32) {
    %c0_i32 = arith.constant 0 : i32
    %c0_i32_0 = arith.constant 0 : i32
    %c0_i32_1 = arith.constant 0 : i32
    return %c0_i32, %c0_i32_0 : i32, i32
  }
  func.func @transform_13(%arg0: i32) -> (i32, i32, i32) {
    %c0_i32 = arith.constant 0 : i32
    %c0_i32_0 = arith.constant 0 : i32
    %c0_i32_1 = arith.constant 0 : i32
    return %arg0, %c0_i32, %c0_i32_0 : i32, i32, i32
  }
}

</mosaic_0001>

<bundles_post_ra>
// kernel: tpu_custom_call.1
= control target key start
LH: loop header
LB: loop body
LE: loop exit
PB: predicated region body
PF: predicated region fallthrough
CT: control target
= control target key end

     0   :  { %s2473_s0 = inlined_call_operand.vmem [shape: f32[2,16,16], index: 0, kind: input, shape index: {}]   ;;  %s2474_s1 = inlined_call_operand.vmem [shape: f32[16,48], index: 1, kind: input, shape index: {}]   ;;  %s2475_s2 = inlined_call_operand.vmem [shape: f32[16,1], index: 2, kind: input, shape index: {}]   ;;  %s2476_s3 = inlined_call_operand.vmem [shape: f32[16,1], index: 3, kind: input, shape index: {}]   ;;  %s2477_s4 = inlined_call_operand.vmem [shape: f32[16,1], index: 4, kind: input, shape index: {}]   ;;  %s2478_s5 = inlined_call_operand.vmem [shape: f32[16,48], index: 5, kind: input, shape index: {}]   ;;  %s2479_s6 = inlined_call_operand.vmem [shape: f32[16,1], index: 6, kind: input, shape index: {}]   ;;  %s2480_s7 = inlined_call_operand.vmem [shape: f32[16,1], index: 7, kind: input, shape index: {}]   ;;  %s2481_s8 = inlined_call_operand.vmem [shape: f32[16,1], index: 8, kind: input, shape index: {}]   ;;  %s2482_s9 = inlined_call_operand.vmem [shape: f32[4,16], index: 9, kind: input, shape index: {}]   ;;  %s2483_s10 = inlined_call_operand.vmem [shape: f32[16,4], index: 10, kind: input, shape index: {}]   ;;  %s2484_s11 = inlined_call_operand.vmem [shape: f32[16,1], index: 11, kind: input, shape index: {}]   ;;  %s2485_s12 = inlined_call_operand.vmem [shape: f32[1,16], index: 12, kind: input, shape index: {}]   ;;  %s2486_s13 = inlined_call_operand.hbm [shape: f32[2,16,16], index: 13, kind: output, shape index: {}]  }
   0x1   :  { %2492 = sst [smem:[#allocation5_spill]] %s2473_s0 }
   0x2   :  { %2493 = sst [smem:[#allocation6_spill]] %s2474_s1 }
   0x3   :  { %18 = vsyncpa [#allocation3], 0 }
   0x4   :  { %20 = vsyncpa [#allocation3 + $0x1], 0  ;;  %s2134_s25 = smov 0   ;;  %s2136_s26 = smov 0  }
   0x5   :  { %s2138_s27 = smov 0   ;;  %s2140_s28 = smov 0  }
   0x6 LB: > { %s2155_s29 = sadd.s32 4294967295, %s2051_s28   ;;  %s1638_s30 = sadd.s32 4294967294, %s2051_s28   ;;  %s2051_s28 = sphi %s2140_s28, %s2508_s28   ;;  %s2047_s27 = sphi %s2138_s27, %s2507_s27   ;;  %s2043_s26 = sphi %s2136_s26, %s2506_s26   ;;  %s2039_s25 = sphi %s2134_s25, %s2505_s25  }
   0x7   : > { %s2159_s14 = sadd.s32 1, %s2051_s28   ;;  %s311_s15 = sadd.s32 1, %s2047_s27 }
   0x8   : > { %s308_s16 = ssub.s32 %s2051_s28, %s2159_s14  ;;  %p321_p0 = scmp.ne.s32.totalorder %s2047_s27, %s2043_s26 }
   0x9   : > { %p309_p1 = scmp.eq.s32.totalorder %s308_s16, 0  ;;  %p322_p2 = scmp.eq.s32.totalorder %s2155_s29, 1 }
   0xa   : > { %p327_p3 = scmp.ne.s32.totalorder %s2043_s26, %s2039_s25  ;;  %p328_p4 = scmp.eq.s32.totalorder %s1638_s30, 1 }
   0xb   : > { %s2170_s17 = scalar_select %p309_p1, %s2047_s27, %s311_s15  }
   0xc   : > { %p2172_p5 = por %p322_p2, %p321_p0  ;;  %p2176_p6 = por %p328_p4, %p327_p3 }
   0xd   : > { %p1641_p7 = scmp.ge.s32.totalorder %s2051_s28, 1  ;;  %p390_p8 = scmp.lt.s32.totalorder %s2051_s28, 3 }
   0xf   : > { %p391_p9 = pnand %p1641_p7, %p390_p8 }
  0x10   : > { %p434_p10 = scmp.lt.s32.totalorder (!%p391_p9), %s2155_s29, 1  ;;  %s2496_s0 = sld [smem:[#allocation5_spill]] (!%p391_p9)  ;;  %vm463_vm0 = vcmask (!%p391_p9), 1047680   ;;  %vm512_vm1 = vcmask (!%p391_p9), 392192   ;;  %v500_v16 = vld [vmem:[%s2475_s2] sm:$0xff] (!%p391_p9)  ;;  %v2056_v17 = vmov (!%p391_p9), 0   ;;  %v441_v19 = vlaneseq (!%p391_p9) }
  0x11   : > { %394 = sbr.rel (%p391_p9) target bundleno = 4204 (0x106c), region = 72  ;;  %s2487_s30 = smov (!%p391_p9), 16   ;;  %1945 = vset.pattern.permute.xlu0 (!%p391_p9), %v2056_v17  ;;  %1946 = vset.pattern.permute.xlu1 (!%p391_p9), %v2056_v17  ;;  %v501_v18 = vld [vmem:[%s2475_s2 + $0x8] sm:$0xff] (!%p391_p9)  ;;  %v460_v34 = vld [vmem:[%s2484_s11] sm:$0xff] (!%p391_p9)  ;;  %vm596_vm6 = vcmask (!%p391_p9), 130048   ;;  %v2057_v45 = vmov (!%p391_p9), 0.0|0.0  }
  0x12   : > { %s2489_s15 = smov (!%p391_p9), 113   ;;  %s2497_s1 = sld [smem:[#allocation6_spill]] (!%p391_p9)  ;;  %v442_v20 = vand.u32 (!%p391_p9), 127, %v441_v19  ;;  %v461_v35 = vld [vmem:[%s2484_s11 + $0x8] sm:$0xff] (!%p391_p9)  ;;  %vm2058_vm7 = vmmov (!%p391_p9), 0   ;;  %v2059_v48 = vmov (!%p391_p9), 0.0  }
  0x13   : > { %s2055_s23 = smov (!%p391_p9), 127   ;;  %v2243_v36 = vpack.c.bf16 (!%p391_p9), %v461_v35, %v460_v34  ;;  %vm702_vm8 = vcmask (!%p391_p9), 7168   ;;  %v2270_v58 = vld [vmem:[%s2482_s9] sm:$0xf] (!%p391_p9)  ;;  %vm789_vm9 = vcmask (!%p391_p9), 31744   ;;  %vm796_vm10 = vcmask (!%p391_p9), 1043456  }
  0x14   : > { %v447_v21 = vand.u32 (!%p391_p9), 15, %v442_v20  ;;  %v2278_v63 = vld [vmem:[%s2483_s10] sm:$0xff] (!%p391_p9)  ;;  %vm919_vm11 = vcmask (!%p391_p9), 1040384   ;;  %s2504_s16 = smov (!%p391_p9), 1   ;;  %s1689_s22 = sshll.u32 (!%p391_p9), %s2155_s29, 8 }
  0x15   : > { %1847 = vmatprep.subr.bf16.mxu1 (!%p391_p9), %v2243_v36 }
  0x16   : > { %vm455_vm2 = vcmp.ge.s32.totalorder (!%p391_p9), %v447_v21, 1  ;;  %vm456_vm4 = vcmp.le.s32.totalorder (!%p391_p9), %v447_v21, 14  ;;  %1849 = vmatpush3.bf16.msra.mxu1 (!%p391_p9), %v2243_v36  ;;  %v887_v21 = vld [vmem:[%s2477_s4] sm:$0xff] (!%p391_p9) }
  0x17   : > { %vm2215_vm3 = vmpackc.low (!%p391_p9), %vm455_vm2, %vm455_vm2  ;;  %1850 = vmatprep.subr.bf16.mxu1 (!%p391_p9), %v2057_v45 }
  0x18   : > { %s435_s20 = scalar_select %p434_p10, %s2155_s29, 1  ;;  %v498_v15 = vld [vmem:[%s2497_s1] sm:$0xff]  ;;  %vm2225_vm5 = vmpackc.low %vm456_vm4, %vm456_vm4  ;;  %v499_v33 = vld [vmem:[%s2497_s1 + $0x8] sm:$0xff] }
  0x19   : > { %1752 = vmatprep.mubr.msk.f32.mxu0 %vm512_vm1, %v498_v15 }
  0x1a   : > { %s1688_s21 = sshll.u32 %s435_s20, 4 }
  0x1b   : > { %s438_s24 = scalar_lea.vmem %s2496_s0, %s1688_s21  ;;  %s2426_s21 = scalar_lea.hbm %s2486_s13, %s1689_s22 }
  0x1c   : > { %v2187_v0 = vld [vmem:[%s438_s24] sm:$0xff]  ;;  %v2189_v1 = vld [vmem:[%s438_s24 + $0x8] sm:$0xff]  ;;  %s2503_s24 = smov 113  }
  0x1d   : > { %v1925_v2 = vpack.i.bf16 %v2189_v1, %v2187_v0  ;;  %v1836_v27 = vpack.c.bf16 %v2189_v1, %v2187_v0 }
  0x1f   : > { %1926 = vrot.lane.b32.xlu0 %v1925_v2, %s2487_s30  ;;  %v876_v2 = vld [vmem:[%s2476_s3 + $0x8] sm:$0xff] }
  0x91   : > { %v1927_v3 = vpop.permute.xlu0 %1926 }
  0x92   : > { %v1929_v4 = vunpack.i.h.bf16 %v1927_v3  ;;  %v1928_v5 = vunpack.i.l.bf16 %v1927_v3  ;;  %v875_v3 = vld [vmem:[%s2476_s3] sm:$0xff] }
  0x94   : > { %v466_v6 = vsel %vm463_vm0, %v1928_v5, %v2187_v0  ;;  %v469_v7 = vsel %vm463_vm0, %v1929_v4, %v2189_v1 }
  0x95   : > { %v1930_v8 = vpack.i.bf16 %v469_v7, %v466_v6 }
  0x97   : > { %1931 = vrot.lane.b32.xlu0 %v1930_v8, %s2487_s30  ;;  %s2490_s30 = smov 1  }
  0x9b   : > { %504 = vperm.xlu0 %1945, %v500_v16  }
 0x109   : > { %v1932_v9 = vpop.permute.xlu0 %1931 }
 0x10a   : > { %v1934_v10 = vunpack.i.h.bf16 %v1932_v9  ;;  %v1933_v11 = vunpack.i.l.bf16 %v1932_v9 }
 0x10c   : > { %v474_v12 = vsel %vm463_vm0, %v1933_v11, %v2187_v0  ;;  %v475_v13 = vsel %vm463_vm0, %v1934_v10, %v2189_v1  ;;  %v2294_v10 = vld [vmem:[%s2483_s10 + $0x8] sm:$0xff]  ;;  %v2303_v11 = vld [vmem:[%s2485_s12] sm:$0x1] }
 0x10d   : > { %v1935_v14 = vpack.i.bf16 %v475_v13, %v474_v12 }
 0x10f   : > { %1936 = vrot.lane.b32.xlu1 %v1935_v14, %s2489_s15  ;;  %s2502_s15 = smov 16  }
 0x113   : > { %1941 = vrot.lane.b32.xlu1 %v1935_v14, %s2055_s23 }
 0x117   : > { %509 = vperm.xlu1 %1946, %v501_v18   ;;  %v888_v18 = vld [vmem:[%s2477_s4 + $0x8] sm:$0xff] }
 0x11a   : > { %v505_v37 = vpop.permute.xlu0 %504 }
 0x181   : > { %v1937_v22 = vpop.permute.xlu1 %1936 }
 0x182   : > { %v1939_v23 = vunpack.i.h.bf16 %v1937_v22  ;;  %v1938_v24 = vunpack.i.l.bf16 %v1937_v22 }
 0x184   : > { %v1830_v26 = vpack.c.bf16 %v1939_v23, %v1938_v24 }
 0x185   : > { %v1942_v28 = vpop.permute.xlu1 %1941 }
 0x186   : > { %v1944_v29 = vunpack.i.h.bf16 %v1942_v28  ;;  %v1943_v30 = vunpack.i.l.bf16 %v1942_v28  ;;  %1832 = vmatprep.subr.msk.bf16.mxu0 %vm2215_vm3, %v1830_v26 }
 0x187   : > { %1835 = vmatpush3.bf16.msk.msra.mxu0 %vm2215_vm3, %v1830_v26 }
 0x188   : > { %1837 = vmatprep.subr.bf16.mxu0 %v1836_v27  ;;  %v1840_v32 = vpack.c.bf16 %v1944_v29, %v1943_v30 }
 0x18b   : > { %1839 = vmatpush3.bf16.msra.mxu0 %v1836_v27 }
 0x18c   : > { %1842 = vmatprep.subr.msk.bf16.mxu0 %vm2225_vm5, %v1840_v32 }
 0x18f   : > { %1845 = vmatpush3.bf16.msk.msra.mxu0 %vm2225_vm5, %v1840_v32 }
 0x192   : > { %1753 = vmatmul.mubr.msk.f32.vlgmr.msra.gmra.mrb[0].mxu0 %vm512_vm1, %v499_v33 }
 0x196   : > { %v510_v38 = vpop.permute.xlu1 %509 }
 0x265   : > { %v1754_v39 = vpop.f32.mrb[0].mxu0 }
 0x266   : > { %v585_v40 = vpop.f32.mrb[1].mxu0  ;;  %v2249_v42 = vadd.f32 %v1754_v39, %v510_v38 }
 0x267   : > { %v2247_v41 = vadd.f32 %v585_v40, %v505_v37 }
 0x268   : > { %v595_v44 = vmul.f32 %v2249_v42, %v2249_v42 }
 0x269   : > { %v594_v43 = vmul.f32 %v2247_v41, %v2247_v41  ;;  %1759 = vmatprep.mubr.msk.f32.mxu1 %vm596_vm6, %v2247_v41 }
 0x26a   : > { %1760 = vmatmul.mubr.msk.f32.vlgmr.msra.gmra.mrb[0].mxu1 %vm596_vm6, %v2249_v42 }
 0x26b   : > { %1762 = vmatprep.mubr.msk.f32.mxu1 %vm596_vm6, %v594_v43 }
 0x26e   : > { %1763 = vmatmul.mubr.msk.f32.gmra.mrb[2].mxu1 %vm596_vm6, %v595_v44 }
 0x26f   : > { %1769 = vmatprep.mubr.msk.f32.mxu1 %vm2058_vm7, %v2059_v48 }
 0x33d   : > { %v1761_v46 = vpop.f32.mrb[0].mxu1 }
 0x33e   : > { %v675_v47 = vpop.f32.mrb[1].mxu1 }
 0x341   : > { %v1764_v49 = vpop.f32.mrb[2].mxu1 }
 0x342   : > { %v685_v50 = vpop.f32.mrb[3].mxu1 }
 0x343   : > { %v1947_v51 = vpack.i.bf16 %v1764_v49, %v685_v50 }
 0x345   : > { %1948 = vrot.lane.b32.xlu1 %v1947_v51, %s2490_s30 }
 0x349   : > { %879 = vrot.lane.b32.xlu1 %v875_v3, %s2490_s30 }
 0x3b7   : > { %v1949_v52 = vpop.permute.xlu1 %1948 }
 0x3b8   : > { %v1951_v53 = vunpack.i.h.bf16 %v1949_v52  ;;  %v1950_v54 = vunpack.i.l.bf16 %v1949_v52 }
 0x3ba   : > { %v704_v55 = vsel %vm702_vm8, %v1761_v46, %v1951_v53  ;;  %v703_v56 = vsel %vm702_vm8, %v675_v47, %v1950_v54 }
 0x3bb   : > { %v1851_v57 = vpack.c.bf16 %v704_v55, %v703_v56  ;;  %v880_v13 = vpop.permute.xlu1 %879 }
 0x3bd   : > { %1852 = vmatpush3.bf16.msra.mxu1 %v1851_v57 }
 0x3c0   : > { %1770 = vmatmul.mubr.msk.f32.vlgmr.msra.gmra.mrb[4].mxu1 %vm596_vm6, %v2270_v58 }
 0x3c1   : > { %1774 = vmatprep.mubr.msk.f32.mxu1 %vm789_vm9, %v2278_v63 }
 0x493   : > { %v774_v59 = vpop.f32.mrb[4].mxu1 }
 0x494   : > { %v778_v60 = vmul.f32 0.015625, %v774_v59  ;;  %v1771_v61 = vpop.f32.mrb[5].mxu1 }
 0x496   : > { %v779_v62 = vmul.f32 %v778_v60, %v778_v60 }
 0x498   : > { %781 = vrot.lane.b32.xlu0 %v779_v62, %s2490_s30 }
 0x49c   : > { %881 = vrot.lane.b32.xlu0 %v876_v2, %s2490_s30 }
 0x50a   : > { %v782_v4 = vpop.permute.xlu0 %781 }
 0x50b   : > { %v784_v5 = vsub.f32 %v778_v60, %v782_v4 }
 0x50d   : > { %v785_v6 = vmax.f32 %v784_v5, 0.0  ;;  %v1052_v5 = vld [vmem:[%s2478_s5] sm:$0xff] }
 0x50e   : > { %v882_v12 = vpop.permute.xlu0 %881  ;;  %1797 = vmatprep.mubr.msk.f32.mxu0 %vm512_vm1, %v1052_v5 }
 0x50f   : > { %v786_v7 = vadd.f32 1e-05, %v785_v6  ;;  %v1055_v6 = vld [vmem:[%s2479_s6 + $0x8] sm:$0xff] }
 0x511   : > { %1977 = vrsqrt.f32 %v786_v7  ;;  %v1054_v7 = vld [vmem:[%s2479_s6] sm:$0xff] }
 0x51b   : > { %v1978_v8 = vpop.eup %1977 }
 0x51c   : > { %v788_v9 = vsel %vm702_vm8, %v778_v60, %v1978_v8 }
 0x51d   : > { %1772 = vmatprep.subr.msk.mxu1 %vm796_vm10, %v788_v9 }
 0x51e   : > { %1773 = vmatpush3.msk.msra.mxu1 %vm796_vm10, %v788_v9 }
 0x51f   : > { %1775 = vmatmul.mubr.msk.f32.vlgmr.msra.gmra.mrb[6].mxu1 %vm789_vm9, %v2294_v10  ;;  %1777 = vmatprep.subr.msk.mxu1 %vm919_vm11, %v2303_v11 }
 0x520   : > { %1778 = vmatpush3.msk.msra.mxu1 %vm919_vm11, %v2303_v11 }
 0x521   : > { %1870 = vmatprep.subr.bf16.mxu1 %v2243_v36 }
 0x5f2   : > { %v1776_v14 = vpop.f32.mrb[6].mxu1 }
 0x5f3   : > { %v886_v15 = vmul.f32 %v1776_v14, %v882_v12  ;;  %v866_v16 = vpop.f32.mrb[7].mxu1 }
 0x5f4   : > { %v885_v17 = vmul.f32 %v880_v13, %v866_v16 }
 0x5f5   : > { %893 = vrot.lane.b32.xlu0 %v886_v15, %s2055_s23 }
 0x5f6   : > { %891 = vrot.lane.b32.xlu1 %v885_v17, %s2055_s23 }
 0x667   : > { %v894_v19 = vpop.permute.xlu0 %893 }
 0x668   : > { %v898_v20 = vmul.f32 %v1776_v14, %v894_v19  ;;  %v892_v22 = vpop.permute.xlu1 %891 }
 0x669   : > { %v897_v23 = vmul.f32 %v892_v22, %v866_v16  ;;  %1779 = vmatprep.mubr.msk.f32.mxu1 %vm702_vm8, %v892_v22 }
 0x66a   : > { %v900_v24 = vsub.f32 %v888_v18, %v898_v20  ;;  %1780 = vmatmul.mubr.msk.f32.vlgmr.msra.gmra.mrb[8].mxu1 %vm702_vm8, %v894_v19  ;;  %v1053_v19 = vld [vmem:[%s2478_s5 + $0x8] sm:$0xff] }
 0x66b   : > { %v899_v26 = vsub.f32 %v887_v21, %v897_v23  ;;  %1872 = vmatpush3.bf16.msra.mxu1 %v2243_v36 }
 0x66c   : > { %905 = vrot.lane.b32.xlu0 %v900_v24, %s2490_s30 }
 0x66d   : > { %903 = vrot.lane.b32.xlu1 %v899_v26, %s2490_s30 }
 0x6de   : > { %v906_v27 = vpop.permute.xlu0 %905 }
 0x6df   : > { %909 = vrot.lane.b32.xlu0 %v906_v27, %s2055_s23  ;;  %v904_v28 = vpop.permute.xlu1 %903 }
 0x6e0   : > { %907 = vrot.lane.b32.xlu1 %v904_v28, %s2055_s23 }
 0x73d   : > { %v1781_v29 = vpop.f32.mrb[8].mxu1 }
 0x73e   : > { %v989_v30 = vpop.f32.mrb[9].mxu1  ;;  %v1009_v34 = vmul.f32 %v1781_v29, %v2249_v42 }
 0x73f   : > { %v1008_v35 = vmul.f32 %v989_v30, %v2247_v41 }
 0x751   : > { %v910_v33 = vpop.permute.xlu0 %909 }
 0x752   : > { %v908_v32 = vpop.permute.xlu1 %907 }
 0x753   : > { %1782 = vmatprep.mubr.msk.f32.mxu1 %vm702_vm8, %v908_v32 }
 0x754   : > { %1783 = vmatmul.mubr.msk.f32.gmra.mrb[10].mxu1 %vm702_vm8, %v910_v33 }
 0x827   : > { %v1784_v36 = vpop.f32.mrb[10].mxu1 }
 0x828   : > { %v1011_v37 = vadd.f32 %v1784_v36, %v1009_v34  ;;  %v999_v38 = vpop.f32.mrb[11].mxu1 }
 0x829   : > { %v1010_v39 = vadd.f32 %v1008_v35, %v999_v38 }
 0x82a   : > { %v1015_v40 = vmul.f32 0.70710677, %v1011_v37  ;;  %v1013_v47 = vmul.f32 0.5, %v1011_v37 }
 0x82b   : > { %v1014_v43 = vmul.f32 0.70710677, %v1010_v39  ;;  %v1012_v50 = vmul.f32 0.5, %v1010_v39 }
 0x82c   : > { %1979 = verf.f32 %v1015_v40  ;;  %v1416_v40 = vld [vmem:[%s2480_s7 + $0x8] sm:$0xff] }
 0x82d   : > { %1981 = verf.f32 %v1014_v43  ;;  %v1415_v43 = vld [vmem:[%s2480_s7] sm:$0xff] }
 0x836   : > { %v1980_v44 = vpop.eup %1979 }
 0x837   : > { %v1982_v46 = vpop.eup %1981  ;;  %v1019_v49 = vadd.f32 1.0, %v1980_v44 }
 0x838   : > { %v1018_v51 = vadd.f32 1.0, %v1982_v46 }
 0x839   : > { %v1021_v52 = vmul.f32 %v1019_v49, %v1013_v47 }
 0x83a   : > { %v1020_v53 = vmul.f32 %v1018_v51, %v1012_v50 }
 0x83c   : > { %v1952_v54 = vpack.i.bf16 %v1021_v52, %v1020_v53  ;;  %v1859_v17 = vpack.c.bf16 %v1021_v52, %v1020_v53 }
 0x83e   : > { %1953 = vrot.lane.b32.xlu1 %v1952_v54, %s2502_s15 }
 0x8b0   : > { %v1954_v41 = vpop.permute.xlu1 %1953 }
 0x8b1   : > { %v1956_v42 = vunpack.i.h.bf16 %v1954_v41  ;;  %v1955_v55 = vunpack.i.l.bf16 %v1954_v41 }
 0x8b3   : > { %v1024_v56 = vsel %vm463_vm0, %v1955_v55, %v1020_v53  ;;  %v1027_v57 = vsel %vm463_vm0, %v1956_v42, %v1021_v52  ;;  %v1428_v42 = vld [vmem:[%s2481_s8 + $0x8] sm:$0xff] }
 0x8b4   : > { %v1957_v59 = vpack.i.bf16 %v1027_v57, %v1024_v56 }
 0x8b6   : > { %1958 = vrot.lane.b32.xlu0 %v1957_v59, %s2502_s15 }
 0x928   : > { %v1959_v60 = vpop.permute.xlu0 %1958 }
 0x929   : > { %v1961_v61 = vunpack.i.h.bf16 %v1959_v60  ;;  %v1960_v62 = vunpack.i.l.bf16 %v1959_v60 }
 0x92b   : > { %v1032_v2 = vsel %vm463_vm0, %v1960_v62, %v1020_v53  ;;  %v1033_v3 = vsel %vm463_vm0, %v1961_v61, %v1021_v52 }
 0x92c   : > { %v1967_v4 = vpack.i.bf16 %v1033_v3, %v1032_v2 }
 0x92e   : > { %1968 = vrot.lane.b32.xlu0 %v1967_v4, %s2055_s23  ;;  %1963 = vrot.lane.b32.xlu1 %v1967_v4, %s2503_s24  ;;  %s2061_s24 = smov [#allocation2]  }
 0x92f   : > { %s1993_s22 = sshll.u32 %s2061_s24, 4  ;;  %s1994_s22 = int_to_ptr.vmem [resolvable:$false] %s1993_s22 }
 0x930   : > { %s1995_s20 = scalar_lea.vmem %s1994_s22, 512 }
 0x932   : > { %1063 = vperm.xlu0 %1945, %v1055_v6   ;;  %1058 = vperm.xlu1 %1946, %v1054_v7  }
 0x9a0   : > { %v1964_v8 = vpop.permute.xlu1 %1963  ;;  %v1969_v13 = vpop.permute.xlu0 %1968 }
 0x9a1   : > { %v1966_v9 = vunpack.i.h.bf16 %v1964_v8  ;;  %v1965_v12 = vunpack.i.l.bf16 %v1964_v8  ;;  %v1971_v15 = vunpack.i.h.bf16 %v1969_v13  ;;  %v1970_v16 = vunpack.i.l.bf16 %v1969_v13 }
 0x9a3   : > { %v1853_v14 = vpack.c.bf16 %v1966_v9, %v1965_v12  ;;  %v1863_v18 = vpack.c.bf16 %v1971_v15, %v1970_v16 }
 0x9a5   : > { %1855 = vmatprep.subr.msk.bf16.mxu0 %vm2215_vm3, %v1853_v14 }
 0x9a6   : > { %1858 = vmatpush3.bf16.msk.msra.mxu0 %vm2215_vm3, %v1853_v14 }
 0x9a7   : > { %1860 = vmatprep.subr.bf16.mxu0 %v1859_v17 }
 0x9aa   : > { %1862 = vmatpush3.bf16.msra.mxu0 %v1859_v17 }
 0x9ab   : > { %1865 = vmatprep.subr.msk.bf16.mxu0 %vm2225_vm5, %v1863_v18 }
 0x9ae   : > { %1868 = vmatpush3.bf16.msk.msra.mxu0 %vm2225_vm5, %v1863_v18 }
 0x9af   : > { %1873 = vmatprep.subr.bf16.mxu0 %v2057_v45 }
 0x9b1   : > { %1798 = vmatmul.mubr.msk.f32.vlgmr.msra.gmra.mrb[2].mxu0 %vm512_vm1, %v1053_v19  ;;  %v1059_v20 = vpop.permute.xlu1 %1058  ;;  %v1064_v22 = vpop.permute.xlu0 %1063 }
 0x9b2   : > { %1814 = vmatprep.mubr.msk.f32.mxu0 %vm2058_vm7, %v2059_v48 }
 0xa84   : > { %v1799_v25 = vpop.f32.mrb[2].mxu0 }
 0xa85   : > { %v1138_v21 = vpop.f32.mrb[3].mxu0  ;;  %v2364_v24 = vadd.f32 %v1799_v25, %v1064_v22 }
 0xa86   : > { %v2362_v23 = vadd.f32 %v1138_v21, %v1059_v20 }
 0xa87   : > { %v1148_v45 = vmul.f32 %v2364_v24, %v2364_v24 }
 0xa88   : > { %v1147_v31 = vmul.f32 %v2362_v23, %v2362_v23  ;;  %1804 = vmatprep.mubr.msk.f32.mxu1 %vm596_vm6, %v2362_v23 }
 0xa89   : > { %1805 = vmatmul.mubr.msk.f32.vlgmr.msra.gmra.mrb[12].mxu1 %vm596_vm6, %v2364_v24 }
 0xa8a   : > { %1807 = vmatprep.mubr.msk.f32.mxu1 %vm596_vm6, %v1147_v31 }
 0xa8d   : > { %1808 = vmatmul.mubr.msk.f32.gmra.mrb[14].mxu1 %vm596_vm6, %v1148_v45 }
 0xa8e   : > { %1819 = vmatprep.mubr.msk.f32.mxu1 %vm789_vm9, %v2278_v63 }
 0xb5c   : > { %v1806_v48 = vpop.f32.mrb[12].mxu1 }
 0xb5d   : > { %v1227_v26 = vpop.f32.mrb[13].mxu1 }
 0xb60   : > { %v1809_v27 = vpop.f32.mrb[14].mxu1 }
 0xb61   : > { %v1237_v28 = vpop.f32.mrb[15].mxu1 }
 0xb62   : > { %v1972_v29 = vpack.i.bf16 %v1809_v27, %v1237_v28 }
 0xb64   : > { %1973 = vrot.lane.b32.xlu1 %v1972_v29, %s2504_s16 }
 0xb68   : > { %1419 = vrot.lane.b32.xlu1 %v1415_v43, %s2504_s16 }
 0xbd6   : > { %v1974_v30 = vpop.permute.xlu1 %1973 }
 0xbd7   : > { %v1976_v32 = vunpack.i.h.bf16 %v1974_v30  ;;  %v1975_v33 = vunpack.i.l.bf16 %v1974_v30 }
 0xbd9   : > { %v1255_v34 = vsel %vm702_vm8, %v1806_v48, %v1976_v32  ;;  %v1254_v35 = vsel %vm702_vm8, %v1227_v26, %v1975_v33 }
 0xbda   : > { %v1874_v36 = vpack.c.bf16 %v1255_v34, %v1254_v35  ;;  %v1420_v51 = vpop.permute.xlu1 %1419 }
 0xbdc   : > { %1875 = vmatpush3.bf16.msra.mxu0 %v1874_v36 }
 0xbdd   : > { %1822 = vmatprep.subr.msk.mxu0 %vm919_vm11, %v2303_v11 }
 0xbdf   : > { %1815 = vmatmul.mubr.msk.f32.vlgmr.msra.gmra.mrb[4].mxu0 %vm596_vm6, %v2270_v58 }
 0xbe0   : > { %1823 = vmatpush3.msk.msra.mxu0 %vm919_vm11, %v2303_v11 }
 0xcb2   : > { %v1322_v63 = vpop.f32.mrb[4].mxu0 }
 0xcb3   : > { %v1326_v37 = vmul.f32 0.015625, %v1322_v63  ;;  %v1816_v38 = vpop.f32.mrb[5].mxu0 }
 0xcb5   : > { %v1327_v39 = vmul.f32 %v1326_v37, %v1326_v37 }
 0xcb7   : > { %1329 = vrot.lane.b32.xlu0 %v1327_v39, %s2504_s16 }
 0xcbb   : > { %1421 = vrot.lane.b32.xlu0 %v1416_v40, %s2504_s16 }
 0xd29   : > { %v1330_v58 = vpop.permute.xlu0 %1329 }
 0xd2a   : > { %v1332_v11 = vsub.f32 %v1326_v37, %v1330_v58 }
 0xd2c   : > { %v1333_v44 = vmax.f32 %v1332_v11, 0.0 }
 0xd2d   : > { %v1422_v50 = vpop.permute.xlu0 %1421 }
 0xd2e   : > { %v1334_v46 = vadd.f32 1e-05, %v1333_v44 }
 0xd30   : > { %1983 = vrsqrt.f32 %v1334_v46 }
 0xd3a   : > { %v1984_v47 = vpop.eup %1983 }
 0xd3b   : > { %v1336_v49 = vsel %vm702_vm8, %v1326_v37, %v1984_v47 }
 0xd3c   : > { %1817 = vmatprep.subr.msk.mxu1 %vm796_vm10, %v1336_v49 }
 0xd3d   : > { %1818 = vmatpush3.msk.msra.mxu1 %vm796_vm10, %v1336_v49 }
 0xd3e   : > { %1820 = vmatmul.mubr.msk.f32.vlgmr.msra.gmra.mrb[16].mxu1 %vm789_vm9, %v2294_v10  ;;  %v1427_v10 = vld [vmem:[%s2481_s8] sm:$0xff] }
 0xe11   : > { %v1821_v52 = vpop.f32.mrb[16].mxu1 }
 0xe12   : > { %v1426_v53 = vmul.f32 %v1821_v52, %v1422_v50  ;;  %v1406_v54 = vpop.f32.mrb[17].mxu1 }
 0xe13   : > { %v1425_v41 = vmul.f32 %v1420_v51, %v1406_v54 }
 0xe14   : > { %1433 = vrot.lane.b32.xlu0 %v1426_v53, %s2055_s23 }
 0xe15   : > { %1431 = vrot.lane.b32.xlu1 %v1425_v41, %s2055_s23 }
 0xe86   : > { %v1434_v55 = vpop.permute.xlu0 %1433 }
 0xe87   : > { %v1438_v56 = vmul.f32 %v1821_v52, %v1434_v55  ;;  %v1432_v57 = vpop.permute.xlu1 %1431 }
 0xe88   : > { %v1437_v59 = vmul.f32 %v1432_v57, %v1406_v54  ;;  %1824 = vmatprep.mubr.msk.f32.mxu0 %vm702_vm8, %v1432_v57 }
 0xe89   : > { %v1440_v60 = vsub.f32 %v1428_v42, %v1438_v56  ;;  %1825 = vmatmul.mubr.msk.f32.vlgmr.msra.gmra.mrb[6].mxu0 %vm702_vm8, %v1434_v55 }
 0xe8a   : > { %v1439_v61 = vsub.f32 %v1427_v10, %v1437_v59 }
 0xe8b   : > { %1445 = vrot.lane.b32.xlu0 %v1440_v60, %s2504_s16 }
 0xe8c   : > { %1443 = vrot.lane.b32.xlu1 %v1439_v61, %s2504_s16 }
 0xefd   : > { %v1446_v62 = vpop.permute.xlu0 %1445 }
 0xefe   : > { %v1444_v2 = vpop.permute.xlu1 %1443  ;;  %1449 = vrot.lane.b32.xlu0 %v1446_v62, %s2055_s23 }
 0xeff   : > { %1447 = vrot.lane.b32.xlu1 %v1444_v2, %s2055_s23  ;;  %s431_s23 = sand.u32 1, %s2043_s26  }
 0xf00   : > { %s1642_s16 = sshll.u32 %s431_s23, 4  ;;  %s2432_s29 = scalar_lea.sflag [#allocation3], %s431_s23 }
 0xf01   : > { %s433_s15 = scalar_lea.vmem [#allocation2], %s1642_s16 }
 0xf02   : > { %s1576_s30 = sshll.u32 %s433_s15, 4  ;;  %s2428_s30 = int_to_ptr.vmem [resolvable:$true] %s1576_s30 }
 0xf03   : > { %s1989_s16 = scalar_lea.vmem %s2428_s30, 256  ;;  %p1996_p0 = scmp.lt.s32.totalorder %s2428_s30, %s1994_s22 }
 0xf04   : > { %p1990_p11 = scmp.ne.s32.totalorder %s2428_s30, %s1989_s16  ;;  %p1997_p1 = scmp.lt.s32.totalorder %s1995_s20, %s1989_s16 }
 0xf06   : > { %p1991_p12 = pnand %p1990_p11, %p2172_p5  ;;  %p1998_p2 = por %p1997_p1, %p1996_p0 }
 0xf08   : > { %p1992_p13 = pneg %p1991_p12 }
 0xf0a   : > { %p1999_p3 = pnand %p1998_p2, %p1992_p13 }
 0xf5c   : > { %v1826_v3 = vpop.f32.mrb[6].mxu0 }
 0xf5d   : > { %v1525_v4 = vpop.f32.mrb[7].mxu0  ;;  %v1545_v7 = vmul.f32 %v1826_v3, %v2364_v24 }
 0xf5e   : > { %v1544_v8 = vmul.f32 %v1525_v4, %v2362_v23 }
 0xf70   : > { %v1450_v6 = vpop.permute.xlu0 %1449 }
 0xf71   : > { %v1448_v5 = vpop.permute.xlu1 %1447 }
 0xf72   : > { %1827 = vmatprep.mubr.msk.f32.mxu0 %vm702_vm8, %v1448_v5 }
 0xf73   : > { %1828 = vmatmul.mubr.msk.f32.gmra.mrb[8].mxu0 %vm702_vm8, %v1450_v6 }
0x1046   : > { %v1829_v9 = vpop.f32.mrb[8].mxu0 }
0x1047   : > { %v1547_v12 = vadd.f32 %v1829_v9, %v1545_v7  ;;  %v1535_v13 = vpop.f32.mrb[9].mxu0 }
0x1048   : > { %v1546_v14 = vadd.f32 %v1544_v8, %v1535_v13 }
0x1049   : > { %v1549_v15 = vadd.f32 %v1547_v12, %v2189_v1 }
0x104a   : > { %v1548_v16 = vadd.f32 %v1546_v14, %v2187_v0 }
0x104b   : > { %v1553_v17 = vmul.f32 0.70710677, %v1549_v15  ;;  %v1551_v20 = vmul.f32 0.5, %v1549_v15 }
0x104c   : > { %v1552_v18 = vmul.f32 0.70710677, %v1548_v16  ;;  %v1550_v22 = vmul.f32 0.5, %v1548_v16 }
0x104d   : > { %1985 = verf.f32 %v1553_v17 }
0x104e   : > { %1987 = verf.f32 %v1552_v18 }
0x1057   : > { %v1986_v19 = vpop.eup %1985 }
0x1058   : > { %v1988_v25 = vpop.eup %1987  ;;  %v1557_v21 = vadd.f32 1.0, %v1986_v19 }
0x1059   : > { %v1556_v23 = vadd.f32 1.0, %v1988_v25 }
0x105a   : > { %v1559_v24 = vmul.f32 %v1557_v21, %v1551_v20 }
0x105b   : > { %v1558_v0 = vmul.f32 %v1556_v23, %v1550_v22 }
0x105c   : > { %1561 = vst.msk [vmem:[%s433_s15 + $0x8] sm:$0xff] %vm596_vm6, %v1559_v24 }
0x105d   : > { %1560 = vst.msk [vmem:[%s433_s15] sm:$0xff] %vm596_vm6, %v1558_v0 }
0x105e   : > { %2002 = shalt.err (!%p1999_p3)
}
0x105f   : > { %s2003_s23 = scalar_lea.hbm %s2426_s21, 256  ;;  %s2007_s24 = scalar_lea.hbm %s2486_s13, 512 }
0x1060   : > { %p2004_p4 = scmp.ne.s32.totalorder %s2426_s21, %s2003_s23  ;;  %p2008_p9 = scmp.lt.u32.totalorder %s2426_s21, %s2486_s13 }
0x1061   : > { %p2009_p10 = scmp.lt.u32.totalorder %s2007_s24, %s2003_s23  ;;  %p2011_p12 = scmp.lt.u32.totalorder %s2003_s23, %s2426_s21 }
0x1062   : > { %p2005_p7 = pnand %p2004_p4, %p2172_p5 }
0x1063   : > { %p2010_p11 = por %p2009_p10, %p2008_p9 }
0x1064   : > { %p2006_p8 = pneg %p2005_p7 }
0x1065   : > { %p2012_p13 = por %p2011_p12, %p2010_p11 }
0x1067   : > { %p2013_p0 = pnand %p2012_p13, %p2006_p8 }
0x1069   : > { %2016 = shalt.err (!%p2013_p0)
}
0x106a   : > { %s2062_s16 = smov 128   ;;  %s2063_s20 = smov 8  }
0x106b   : > { %1876 = dma.vmem_to_hbm [thread:$0]  (%p2172_p5), %s2428_s30, 256, %s2426_s21, %s2432_s29, %s2062_s16, %s2062_s16, %s2063_s20  }
0x106c PF: > { %p1882_p1 = scmp.ge.s32.totalorder %s2051_s28, 2  ;;  %s1591_s0 = sand.u32 1, %s2039_s25  }
0x106d   : > { %s1592_s1 = scalar_lea.sflag [#allocation3], %s1591_s0 }
0x106e   : > { %p1879_p2 = pnand %p1882_p1, %p2176_p6 }
0x1070   : > { %2034 = dma.done.wait (!%p1879_p2), %s1592_s1, 256  }
0x1071   : > { %2036 = vsyncadd (!%p1879_p2), %s1592_s1, 4294967040  ;;  %p23_p3 = scmp.ge.s32.totalorder %s2159_s14, 4   ;;  %s2505_s25 = smov %s2043_s26 }
0x1072   : > { %s2506_s26 = smov %s2047_s27  ;;  %s2507_s27 = smov %s2170_s17 }
0x1073   : > { %s2508_s28 = smov %s2159_s14  ;;  %25 = sbr.rel (!%p23_p3) target bundleno = 6 (0x6), region = 107 }
0x107a   :  { %1597 = vsyncpa [#allocation3], 1 }
0x107b   :  { %1599 = vsyncpa [#allocation3 + $0x1], 1 }

</bundles_post_ra>
